<compile_context>
chip_gen: v6e
topology: v6e:2x2x1
jax: 0.10.0
libtpu: 0.0.40
codegen_flags: <defaults>
</compile_context>

<pallas_src>
import functools

import numpy as np
import jax
import jax.numpy as jnp
from jax.experimental import pallas as pl
from jax.experimental.pallas import tpu as pltpu


def _round_up(x, m):
    return (x + m - 1) // m * m


def _tap_masks(H, W, bt):
    """[9, bt*H*W] float32: 1.0 where the (dh, dw) neighbour of a pixel exists inside
    its own image. Kills the column wrap, row wrap and image-to-image wrap that the
    cyclic lane roll would otherwise introduce. Built with numpy -> compile-time
    constant under jit."""
    p = np.arange(bt * H * W)
    row = (p % (H * W)) // W
    col = p % W
    masks = np.empty((9, bt * H * W), np.float32)
    for kh in range(3):
        for kw in range(3):
            dh, dw = kh - 1, kw - 1
            ok = ((row + dh >= 0) & (row + dh < H) &
                  (col + dw >= 0) & (col + dw < W))
            masks[kh * 3 + kw] = ok.astype(np.float32)
    return masks


def prepare_image_extractor_params(w_t, b):
    """One-time host-side weight prep (hoisted out of the per-call forward path).

    w_t: ConvTranspose2d weight [C, OC, 3, 3] ([in, out, kH, kW]); b: [OC].
    ConvTranspose2d(s=1, p=1, k=3) == same-padded 3x3 conv with the spatially flipped
    kernel and swapped channel axes: w_conv[o, i, kh, kw] = w_t[i, o, 2-kh, 2-kw].
    Returns (w2d [OCp, 9*Cp], b_pad [OCp, 1]) with the conv weight laid out
    im2col-style (tap-major, input-channel-minor), zero-padded to sublane multiples.
    The padded output rows (OC..OCp) only ever hold sigmoid(0-ish) garbage and are
    sliced away by the wrapper; padded input channels contribute zero via zero weights.
    """
    w_t = np.asarray(w_t, np.float32)
    b = np.asarray(b, np.float32)
    C, OC = w_t.shape[0], w_t.shape[1]
    Cp = _round_up(C, 8)
    OCp = _round_up(OC, 8)
    w_conv = np.transpose(w_t[:, :, ::-1, ::-1], (1, 0, 2, 3))      # [OC, C, 3, 3]
    w2d = np.zeros((OCp, 9 * Cp), np.float32)
    for kh in range(3):
        for kw in range(3):
            t = kh * 3 + kw
            w2d[:OC, t * Cp:t * Cp + C] = w_conv[:, :, kh, kw]
    b_pad = np.zeros((OCp, 1), np.float32)
    b_pad[:OC, 0] = b
    return jnp.asarray(w2d), jnp.asarray(b_pad)


def _convt3x3_sigmoid_kernel(x_ref, w_ref, b_ref, m_ref, o_ref, col_ref, *, W):
    """Fused im2col 3x3 conv (== ConvTranspose2d(k=3, s=1, p=1)) + sigmoid.

    x_ref:   [Cp, N]      channel-padded image slab, N = bt*H*W (lane-dense)  (VMEM)
    w_ref:   [OCp, 9*Cp]  im2col conv weight (tap-major, channel-minor)       (VMEM)
    b_ref:   [OCp, 1]     bias, zero-padded                                   (VMEM)
    m_ref:   [9, N]       per-tap neighbour-validity mask (1.0 / 0.0)         (VMEM)
    o_ref:   [OCp, N]     sigmoid(conv) output, lane-dense                    (VMEM)
    col_ref: [9*Cp, N]    im2col scratch                                      (VMEM)
    """
    Cp, N = x_ref.shape
    x = x_ref[...]

    # Build the im2col slab: each tap is an XLU lane-roll of the resident slab, with
    # out-of-image neighbours zeroed by the precomputed mask (broadcast over sublanes).
    for kh in range(3):
        for kw in range(3):
            t = kh * 3 + kw
            dh, dw = kh - 1, kw - 1
            off = dh * W + dw
            if off == 0:
                col_ref[t * Cp:(t + 1) * Cp, :] = x        # centre tap: no roll/mask
            else:
                rolled = pltpu.roll(x, shift=(-off) % N, axis=1)
                col_ref[t * Cp:(t + 1) * Cp, :] = rolled * m_ref[t:t + 1, :]

    # Single MXU matmul over the fused 9*Cp contraction, f32 accumulation.
    acc = jnp.dot(w_ref[...], col_ref[...], preferred_element_type=jnp.float32)
    acc = acc + b_ref[...]

    # sigmoid(x) = 1 / (1 + exp(-x)): exp on the EUP, approx reciprocal instead of a
    # full VALU divide (EUP slot is otherwise idle here).
    o_ref[...] = pl.reciprocal(1.0 + jnp.exp(-acc), approx=True).astype(o_ref.dtype)


def image_extractor_forward(x, w2d, b_pad, out_chans=3):
    """x: [C, H, W] or [B, C, H, W]; (w2d, b_pad) from prepare_image_extractor_params.
    Returns sigmoid(conv_transpose2d(x)) with shape [3, H, W] / [B, 3, H, W]."""
    squeeze = (x.ndim == 3)
    if squeeze:
        x = x[None]
    B, C, H, W = x.shape
    HW = H * W
    OCp, K9 = w2d.shape
    Cp = K9 // 9
    assert C <= Cp

    bt = min(B, 8)                 # images folded into the lane dim per grid step
    nb = -(-B // bt)               # batch tiles (grid length)
    Bp = nb * bt
    N = bt * HW                    # lanes per grid step (512 for bt=2, 16x16)

    # [B, C, H, W] -> [Cp, Bp*HW]: channels on sublanes, (image, pixel) on lanes.
    # Channel-pad to Cp so every in-kernel access is full-sublane.
    xs = jnp.transpose(x, (1, 0, 2, 3)).reshape(C, B * HW).astype(jnp.float32)
    x_slab = jnp.zeros((Cp, Bp * HW), jnp.float32).at[:C, :B * HW].set(xs)

    mask9 = jnp.asarray(_tap_masks(H, W, bt))      # trace-time constant, [9, N]

    kernel = functools.partial(_convt3x3_sigmoid_kernel, W=W)
    out_flat = pl.pallas_call(
        kernel,
        out_shape=jax.ShapeDtypeStruct((OCp, Bp * HW), jnp.float32),
        grid=(nb,),
        in_specs=[
            pl.BlockSpec((Cp, N), lambda i: (0, i)),      # batch tile of images
            pl.BlockSpec((OCp, K9), lambda i: (0, 0)),    # weights (resident)
            pl.BlockSpec((OCp, 1), lambda i: (0, 0)),     # bias
            pl.BlockSpec((9, N), lambda i: (0, 0)),       # tap wrap masks
        ],
        out_specs=pl.BlockSpec((OCp, N), lambda i: (0, i)),
        scratch_shapes=[pltpu.VMEM((K9, N), jnp.float32)],
        compiler_params=pltpu.CompilerParams(
            dimension_semantics=("parallel",)),           # shard batch tiles (v7x)
    )(x_slab, w2d, b_pad, mask9)

    out = out_flat[:out_chans, :B * HW].reshape(out_chans, B, H, W)
    out = jnp.transpose(out, (1, 0, 2, 3))
    if squeeze:
        out = out[0]
    return out


def _reference_conv_transpose_sigmoid(x, w_t, b):
    """Naive numpy ConvTranspose2d(stride=1, padding=1) + sigmoid, for checking."""
    x = np.asarray(x, np.float64)
    w_t = np.asarray(w_t, np.float64)
    b = np.asarray(b, np.float64)
    Ci, H, W = x.shape
    Co = w_t.shape[1]
    K, pad = 3, 1
    full = np.zeros((Co, H + K - 1, W + K - 1), dtype=np.float64)
    for i in range(Ci):
        for o in range(Co):
            for kh in range(K):
                for kw in range(K):
                    full[o, kh:kh + H, kw:kw + W] += x[i] * w_t[i, o, kh, kw]
    out = full[:, pad:pad + H, pad:pad + W] + b[:, None, None]
    return 1.0 / (1.0 + np.exp(-out))


if __name__ == "__main__":
    B, in_chans, H, W = 2, 4, 16, 16
    out_chans = 3

    key = jax.random.PRNGKey(0)
    kx, kw, kb = jax.random.split(key, 3)

    # Deterministic params (shapes match nn.ConvTranspose2d(in_chans, 3, 3, 1, 1)).
    fan = in_chans * 3 * 3
    bound = 1.0 / np.sqrt(fan)
    w_t = jax.random.uniform(kw, (in_chans, out_chans, 3, 3), jnp.float32, -bound, bound)
    bias = jax.random.uniform(kb, (out_chans,), jnp.float32, -bound, bound)
    x = jax.random.normal(kx, (B, in_chans, H, W), jnp.float32)

    # One-time parameter prep (hoisted out of the forward path).
    w2d, b_pad = prepare_image_extractor_params(w_t, bias)

    fwd = jax.jit(image_extractor_forward)
    out = jax.block_until_ready(fwd(x, w2d, b_pad))
    assert out.shape == (B, out_chans, H, W)

    x_np = np.asarray(x)
    for bidx in range(B):
        ref = _reference_conv_transpose_sigmoid(x_np[bidx], np.asarray(w_t), np.asarray(bias))
        # Tolerance accounts for the approx-reciprocal sigmoid (error ~1e-4 abs).
        np.testing.assert_allclose(np.asarray(out)[bidx], ref, rtol=2e-3, atol=2e-3)

    print("KERNEL_OK")
</pallas_src>

<mosaic_0001>
module attributes {stable_mosaic.version = 11 : i64} {
  func.func @_convt3x3_sigmoid_kernel(%arg0: i32, %arg1: memref<8x512xf32, #tpu.memory_space<vmem>>, %arg2: memref<8x72xf32, #tpu.memory_space<vmem>>, %arg3: memref<8x1xf32, #tpu.memory_space<vmem>>, %arg4: memref<9x512xf32, #tpu.memory_space<vmem>>, %arg5: memref<8x512xf32, #tpu.memory_space<vmem>>, %arg6: memref<72x512xf32, #tpu.memory_space<vmem>>) attributes {dimension_semantics = [#tpu.dimension_semantics<parallel>], iteration_bounds = array<i64: 1>, scalar_prefetch = 0 : i64, scratch_operands = 1 : i64, tpu.core_type = #tpu.core_type<tc>, window_params = [{transform_indices = @transform_0, window_bounds = array<i64: 8, 512>}, {pipeline_mode = #tpu.pipeline_mode<synchronous>, transform_indices = @transform_1, window_bounds = array<i64: 8, 72>}, {pipeline_mode = #tpu.pipeline_mode<synchronous>, transform_indices = @transform_2, window_bounds = array<i64: 8, 1>}, {pipeline_mode = #tpu.pipeline_mode<synchronous>, transform_indices = @transform_3, window_bounds = array<i64: 9, 512>}, {transform_indices = @transform_4, window_bounds = array<i64: 8, 512>}]} {
    %c0 = arith.constant 0 : index
    %c0_0 = arith.constant 0 : index
    %0 = vector.load %arg1[%c0, %c0_0] : memref<8x512xf32, #tpu.memory_space<vmem>>, vector<8x512xf32>
    %c17_i32 = arith.constant 17 : i32
    %1 = tpu.dynamic_rotate %0 by %c17_i32 dim 1 : vector<8x512xf32>, i32 -> vector<8x512xf32>
    %c0_1 = arith.constant 0 : index
    %c0_2 = arith.constant 0 : index
    %2 = vector.load %arg4[%c0_1, %c0_2] : memref<9x512xf32, #tpu.memory_space<vmem>>, vector<1x512xf32>
    %3 = vector.broadcast %2 : vector<1x512xf32> to vector<8x512xf32>
    %4 = arith.mulf %1, %3 : vector<8x512xf32>
    %c0_3 = arith.constant 0 : index
    %c0_4 = arith.constant 0 : index
    %5 = vector.load %arg6[%c0_3, %c0_4] : memref<72x512xf32, #tpu.memory_space<vmem>>, vector<8x512xf32>
    tpu.vector_store %arg6[%c0_3, %c0_4], %4 {strides = array<i32>} : memref<72x512xf32, #tpu.memory_space<vmem>>, vector<8x512xf32>,
    %c16_i32 = arith.constant 16 : i32
    %6 = tpu.dynamic_rotate %0 by %c16_i32 dim 1 : vector<8x512xf32>, i32 -> vector<8x512xf32>
    %c1 = arith.constant 1 : index
    %c0_5 = arith.constant 0 : index
    %7 = vector.load %arg4[%c1, %c0_5] : memref<9x512xf32, #tpu.memory_space<vmem>>, vector<1x512xf32>
    %8 = vector.broadcast %7 : vector<1x512xf32> to vector<8x512xf32>
    %9 = arith.mulf %6, %8 : vector<8x512xf32>
    %c8 = arith.constant 8 : index
    %c0_6 = arith.constant 0 : index
    %10 = vector.load %arg6[%c8, %c0_6] : memref<72x512xf32, #tpu.memory_space<vmem>>, vector<8x512xf32>
    tpu.vector_store %arg6[%c8, %c0_6], %9 {strides = array<i32>} : memref<72x512xf32, #tpu.memory_space<vmem>>, vector<8x512xf32>,
    %c15_i32 = arith.constant 15 : i32
    %11 = tpu.dynamic_rotate %0 by %c15_i32 dim 1 : vector<8x512xf32>, i32 -> vector<8x512xf32>
    %c2 = arith.constant 2 : index
    %c0_7 = arith.constant 0 : index
    %12 = vector.load %arg4[%c2, %c0_7] : memref<9x512xf32, #tpu.memory_space<vmem>>, vector<1x512xf32>
    %13 = vector.broadcast %12 : vector<1x512xf32> to vector<8x512xf32>
    %14 = arith.mulf %11, %13 : vector<8x512xf32>
    %c16 = arith.constant 16 : index
    %c0_8 = arith.constant 0 : index
    %15 = vector.load %arg6[%c16, %c0_8] : memref<72x512xf32, #tpu.memory_space<vmem>>, vector<8x512xf32>
    tpu.vector_store %arg6[%c16, %c0_8], %14 {strides = array<i32>} : memref<72x512xf32, #tpu.memory_space<vmem>>, vector<8x512xf32>,
    %c1_i32 = arith.constant 1 : i32
    %16 = tpu.dynamic_rotate %0 by %c1_i32 dim 1 : vector<8x512xf32>, i32 -> vector<8x512xf32>
    %c3 = arith.constant 3 : index
    %c0_9 = arith.constant 0 : index
    %17 = vector.load %arg4[%c3, %c0_9] : memref<9x512xf32, #tpu.memory_space<vmem>>, vector<1x512xf32>
    %18 = vector.broadcast %17 : vector<1x512xf32> to vector<8x512xf32>
    %19 = arith.mulf %16, %18 : vector<8x512xf32>
    %c24 = arith.constant 24 : index
    %c0_10 = arith.constant 0 : index
    %20 = vector.load %arg6[%c24, %c0_10] : memref<72x512xf32, #tpu.memory_space<vmem>>, vector<8x512xf32>
    tpu.vector_store %arg6[%c24, %c0_10], %19 {strides = array<i32>} : memref<72x512xf32, #tpu.memory_space<vmem>>, vector<8x512xf32>,
    %c32 = arith.constant 32 : index
    %c0_11 = arith.constant 0 : index
    %21 = vector.load %arg6[%c32, %c0_11] : memref<72x512xf32, #tpu.memory_space<vmem>>, vector<8x512xf32>
    tpu.vector_store %arg6[%c32, %c0_11], %0 {strides = array<i32>} : memref<72x512xf32, #tpu.memory_space<vmem>>, vector<8x512xf32>,
    %c511_i32 = arith.constant 511 : i32
    %22 = tpu.dynamic_rotate %0 by %c511_i32 dim 1 : vector<8x512xf32>, i32 -> vector<8x512xf32>
    %c5 = arith.constant 5 : index
    %c0_12 = arith.constant 0 : index
    %23 = vector.load %arg4[%c5, %c0_12] : memref<9x512xf32, #tpu.memory_space<vmem>>, vector<1x512xf32>
    %24 = vector.broadcast %23 : vector<1x512xf32> to vector<8x512xf32>
    %25 = arith.mulf %22, %24 : vector<8x512xf32>
    %c40 = arith.constant 40 : index
    %c0_13 = arith.constant 0 : index
    %26 = vector.load %arg6[%c40, %c0_13] : memref<72x512xf32, #tpu.memory_space<vmem>>, vector<8x512xf32>
    tpu.vector_store %arg6[%c40, %c0_13], %25 {strides = array<i32>} : memref<72x512xf32, #tpu.memory_space<vmem>>, vector<8x512xf32>,
    %c497_i32 = arith.constant 497 : i32
    %27 = tpu.dynamic_rotate %0 by %c497_i32 dim 1 : vector<8x512xf32>, i32 -> vector<8x512xf32>
    %c6 = arith.constant 6 : index
    %c0_14 = arith.constant 0 : index
    %28 = vector.load %arg4[%c6, %c0_14] : memref<9x512xf32, #tpu.memory_space<vmem>>, vector<1x512xf32>
    %29 = vector.broadcast %28 : vector<1x512xf32> to vector<8x512xf32>
    %30 = arith.mulf %27, %29 : vector<8x512xf32>
    %c48 = arith.constant 48 : index
    %c0_15 = arith.constant 0 : index
    %31 = vector.load %arg6[%c48, %c0_15] : memref<72x512xf32, #tpu.memory_space<vmem>>, vector<8x512xf32>
    tpu.vector_store %arg6[%c48, %c0_15], %30 {strides = array<i32>} : memref<72x512xf32, #tpu.memory_space<vmem>>, vector<8x512xf32>,
    %c496_i32 = arith.constant 496 : i32
    %32 = tpu.dynamic_rotate %0 by %c496_i32 dim 1 : vector<8x512xf32>, i32 -> vector<8x512xf32>
    %c7 = arith.constant 7 : index
    %c0_16 = arith.constant 0 : index
    %33 = vector.load %arg4[%c7, %c0_16] : memref<9x512xf32, #tpu.memory_space<vmem>>, vector<1x512xf32>
    %34 = vector.broadcast %33 : vector<1x512xf32> to vector<8x512xf32>
    %35 = arith.mulf %32, %34 : vector<8x512xf32>
    %c56 = arith.constant 56 : index
    %c0_17 = arith.constant 0 : index
    %36 = vector.load %arg6[%c56, %c0_17] : memref<72x512xf32, #tpu.memory_space<vmem>>, vector<8x512xf32>
    tpu.vector_store %arg6[%c56, %c0_17], %35 {strides = array<i32>} : memref<72x512xf32, #tpu.memory_space<vmem>>, vector<8x512xf32>,
    %c495_i32 = arith.constant 495 : i32
    %37 = tpu.dynamic_rotate %0 by %c495_i32 dim 1 : vector<8x512xf32>, i32 -> vector<8x512xf32>
    %c8_18 = arith.constant 8 : index
    %c0_19 = arith.constant 0 : index
    %38 = vector.load %arg4[%c8_18, %c0_19] : memref<9x512xf32, #tpu.memory_space<vmem>>, vector<1x512xf32>
    %39 = vector.broadcast %38 : vector<1x512xf32> to vector<8x512xf32>
    %40 = arith.mulf %37, %39 : vector<8x512xf32>
    %c64 = arith.constant 64 : index
    %c0_20 = arith.constant 0 : index
    %41 = vector.load %arg6[%c64, %c0_20] : memref<72x512xf32, #tpu.memory_space<vmem>>, vector<8x512xf32>
    tpu.vector_store %arg6[%c64, %c0_20], %40 {strides = array<i32>} : memref<72x512xf32, #tpu.memory_space<vmem>>, vector<8x512xf32>,
    %c0_21 = arith.constant 0 : index
    %c0_22 = arith.constant 0 : index
    %42 = vector.load %arg2[%c0_21, %c0_22] : memref<8x72xf32, #tpu.memory_space<vmem>>, vector<8x72xf32>
    %c0_23 = arith.constant 0 : index
    %c0_24 = arith.constant 0 : index
    %43 = vector.load %arg6[%c0_23, %c0_24] : memref<72x512xf32, #tpu.memory_space<vmem>>, vector<72x512xf32>
    %cst = arith.constant dense<0.000000e+00> : vector<8x512xf32>
    %44 = tpu.matmul %42, %43, %cst {dimension_numbers = #tpu.dot_dimension_numbers<[1], [0], [0], [1], [0, 0, 1, 1], [], []>} : vector<8x72xf32>, vector<72x512xf32>, vector<8x512xf32> -> vector<8x512xf32>
    %c0_25 = arith.constant 0 : index
    %c0_26 = arith.constant 0 : index
    %45 = vector.load %arg3[%c0_25, %c0_26] : memref<8x1xf32, #tpu.memory_space<vmem>>, vector<8x1xf32>
    %46 = vector.broadcast %45 : vector<8x1xf32> to vector<8x512xf32>
    %47 = arith.addf %44, %46 : vector<8x512xf32>
    %cst_27 = arith.constant 0.000000e+00 : f32
    %48 = vector.broadcast %cst_27 : f32 to vector<8x512xf32>
    %49 = arith.subf %48, %47 : vector<8x512xf32>
    %50 = math.exp %49 : vector<8x512xf32>
    %cst_28 = arith.constant 1.000000e+00 : f32
    %51 = vector.broadcast %cst_28 : f32 to vector<8x512xf32>
    %52 = arith.addf %51, %50 : vector<8x512xf32>
    %53 = tpu.reciprocal %52 {approx = true} : vector<8x512xf32> -> vector<8x512xf32>
    %c0_29 = arith.constant 0 : index
    %c0_30 = arith.constant 0 : index
    %54 = vector.load %arg5[%c0_29, %c0_30] : memref<8x512xf32, #tpu.memory_space<vmem>>, vector<8x512xf32>
    tpu.vector_store %arg5[%c0_29, %c0_30], %53 {strides = array<i32>} : memref<8x512xf32, #tpu.memory_space<vmem>>, vector<8x512xf32>,
    return
  }
  func.func @transform_0(%arg0: i32) -> (i32, i32) {
    %c0_i32 = arith.constant 0 : i32
    %c0_i32_0 = arith.constant 0 : i32
    return %c0_i32, %arg0 : i32, i32
  }
  func.func @transform_1(%arg0: i32) -> (i32, i32) {
    %c0_i32 = arith.constant 0 : i32
    %c0_i32_0 = arith.constant 0 : i32
    %c0_i32_1 = arith.constant 0 : i32
    return %c0_i32, %c0_i32_0 : i32, i32
  }
  func.func @transform_2(%arg0: i32) -> (i32, i32) {
    %c0_i32 = arith.constant 0 : i32
    %c0_i32_0 = arith.constant 0 : i32
    %c0_i32_1 = arith.constant 0 : i32
    return %c0_i32, %c0_i32_0 : i32, i32
  }
  func.func @transform_3(%arg0: i32) -> (i32, i32) {
    %c0_i32 = arith.constant 0 : i32
    %c0_i32_0 = arith.constant 0 : i32
    %c0_i32_1 = arith.constant 0 : i32
    return %c0_i32, %c0_i32_0 : i32, i32
  }
  func.func @transform_4(%arg0: i32) -> (i32, i32) {
    %c0_i32 = arith.constant 0 : i32
    %c0_i32_0 = arith.constant 0 : i32
    return %c0_i32, %arg0 : i32, i32
  }
}

</mosaic_0001>

<bundles_post_ra>
// kernel: image_extractor_forward.1
= control target key start
LH: loop header
LB: loop body
LE: loop exit
PB: predicated region body
PF: predicated region fallthrough
CT: control target
= control target key end

     0   :  { %s631_s19 = smov 111   ;;  %s632_s24 = smov 112   ;;  %v638_v4 = vmov 0.0   ;;  %v639_v5 = vmov 0   ;;  %v29_v7 = vlaneseq  ;;  %vm421_vm8 = vcmask 588800   ;;  %s846_s0 = inlined_call_operand.vmem [shape: f32[8,512], index: 0, kind: input, shape index: {}]   ;;  %s847_s2 = inlined_call_operand.vmem [shape: f32[8,1], index: 2, kind: input, shape index: {}]   ;;  %s848_s3 = inlined_call_operand.vmem [shape: f32[9,512], index: 3, kind: input, shape index: {}]   ;;  %s849_s1 = inlined_call_operand.vmem [shape: f32[8,72], index: 1, kind: input, shape index: {}]   ;;  %s850_s4 = inlined_call_operand.vmem [shape: f32[8,512], index: 4, kind: output, shape index: {}]  }
   0x1   :  { %v669_v0 = vld [vmem:[%s846_s0 + $0x10] sm:$0xff]  ;;  %v674_v1 = vld [vmem:[%s846_s0] sm:$0xff]  ;;  %v681_v2 = vld [vmem:[%s846_s0 + $0x18] sm:$0xff]  ;;  %s633_s25 = smov 113   ;;  %s635_s26 = smov 1   ;;  %489 = vmatprep.mubr.f32.mxu0 %v638_v4  ;;  %560 = vmatprep.mubr.f32.mxu1 %v638_v4 }
   0x2   :  { %338 = vrot.lane.b32.xlu1 %v669_v0, %s631_s19  ;;  %334 = vrot.lane.b32.xlu0 %v674_v1, %s631_s19  ;;  %v686_v3 = vld [vmem:[%s846_s0 + $0x8] sm:$0xff]  ;;  %s634_s0 = smov 127   ;;  %s636_s27 = smov 15   ;;  %v415_v6 = vld [vmem:[%s847_s2] sm:$0xff]  ;;  %v39_v8 = vshrl.u32 %v29_v7, 7  ;;  %v721_v9 = vand.u32 127, %v29_v7 }
   0x3   :  { %s637_s28 = smov 16   ;;  %614 = vset.pattern.permute.xlu0 %v639_v5  ;;  %s640_s29 = smov 17   ;;  %v601_v14 = vld [vmem:[%s848_s3 + $0x20] ss:$8 sm:$0xf] }
   0x4   :  { %v723_v10 = vsub.s32 1, %v39_v8  ;;  %v725_v11 = vsub.s32 3, %v39_v8  ;;  %v727_v12 = vsub.s32 0, %v39_v8  ;;  %v729_v13 = vsub.s32 2, %v39_v8 }
   0x5   :  { %vm342_vm0 = vcmp.lt.s32.totalorder %v721_v9, 111  ;;  %v600_v32 = vld [vmem:[%s848_s3 + $0x7] ss:$8 sm:$0xf]  ;;  %vm298_vm1 = vcmp.lt.s32.totalorder %v721_v9, 112  ;;  %vm254_vm2 = vcmp.lt.s32.totalorder %v721_v9, 113 }
   0x6   :  { %340 = vrot.lane.b32.xlu1 %v681_v2, %s631_s19  ;;  %336 = vrot.lane.b32.xlu0 %v686_v3, %s631_s19  ;;  %v357_v17 = vrot.slane %v601_v14, %v723_v10  ;;  %v365_v18 = vrot.slane %v601_v14, %v725_v11  ;;  %v353_v19 = vrot.slane %v601_v14, %v727_v12  ;;  %v599_v49 = vld [vmem:[%s848_s3 + $0x6] ss:$8 sm:$0xf]  ;;  %vm210_vm3 = vcmp.lt.s32.totalorder %v721_v9, 127 }
   0x7   :  { %v361_v20 = vrot.slane %v601_v14, %v729_v13  ;;  %v321_v34 = vrot.slane %v600_v32, %v725_v11  ;;  %v313_v35 = vrot.slane %v600_v32, %v723_v10  ;;  %v317_v36 = vrot.slane %v600_v32, %v729_v13 }
   0x8   :  { %v309_v37 = vrot.slane %v600_v32, %v727_v12  ;;  %v277_v51 = vrot.slane %v599_v49, %v725_v11  ;;  %v269_v52 = vrot.slane %v599_v49, %v723_v10  ;;  %v273_v53 = vrot.slane %v599_v49, %v729_v13 }
   0x9   :  { %v265_v54 = vrot.slane %v599_v49, %v727_v12  ;;  %vm162_vm4 = vcmp.lt.s32.totalorder %v721_v9, 1  ;;  %vm118_vm5 = vcmp.lt.s32.totalorder %v721_v9, 15  ;;  %v595_v49 = vld [vmem:[%s848_s3 + $0x1] ss:$8 sm:$0xf]  ;;  %vm74_vm6 = vcmp.lt.s32.totalorder %v721_v9, 16 }
   0xa   :  { %292 = vrot.lane.b32.xlu1 %v686_v3, %s632_s24  ;;  %290 = vrot.lane.b32.xlu0 %v674_v1, %s632_s24  ;;  %vm31_vm7 = vcmp.lt.s32.totalorder %v721_v9, 17 }
   0xe   :  { %296 = vrot.lane.b32.xlu1 %v681_v2, %s632_s24  ;;  %294 = vrot.lane.b32.xlu0 %v669_v0, %s632_s24 }
  0x12   :  { %248 = vrot.lane.b32.xlu1 %v686_v3, %s633_s25  ;;  %246 = vrot.lane.b32.xlu0 %v674_v1, %s633_s25 }
  0x16   :  { %252 = vrot.lane.b32.xlu1 %v681_v2, %s633_s25  ;;  %250 = vrot.lane.b32.xlu0 %v669_v0, %s633_s25 }
  0x1a   :  { %204 = vrot.lane.b32.xlu1 %v686_v3, %s634_s0  ;;  %202 = vrot.lane.b32.xlu0 %v674_v1, %s634_s0 }
  0x1e   :  { %208 = vrot.lane.b32.xlu1 %v681_v2, %s634_s0  ;;  %206 = vrot.lane.b32.xlu0 %v669_v0, %s634_s0 }
  0x22   :  { %156 = vrot.lane.b32.xlu1 %v686_v3, %s635_s26  ;;  %154 = vrot.lane.b32.xlu0 %v674_v1, %s635_s26 }
  0x26   :  { %160 = vrot.lane.b32.xlu1 %v681_v2, %s635_s26  ;;  %158 = vrot.lane.b32.xlu0 %v669_v0, %s635_s26 }
  0x2a   :  { %112 = vrot.lane.b32.xlu1 %v686_v3, %s636_s27  ;;  %110 = vrot.lane.b32.xlu0 %v674_v1, %s636_s27 }
  0x2e   :  { %116 = vrot.lane.b32.xlu1 %v681_v2, %s636_s27  ;;  %114 = vrot.lane.b32.xlu0 %v669_v0, %s636_s27 }
  0x32   :  { %68 = vrot.lane.b32.xlu1 %v686_v3, %s637_s28  ;;  %66 = vrot.lane.b32.xlu0 %v674_v1, %s637_s28 }
  0x36   :  { %72 = vrot.lane.b32.xlu1 %v681_v2, %s637_s28  ;;  %70 = vrot.lane.b32.xlu0 %v669_v0, %s637_s28 }
  0x3a   :  { %23 = vrot.lane.b32.xlu1 %v686_v3, %s640_s29  ;;  %21 = vrot.lane.b32.xlu0 %v674_v1, %s640_s29 }
  0x3e   :  { %27 = vrot.lane.b32.xlu1 %v681_v2, %s640_s29  ;;  %25 = vrot.lane.b32.xlu0 %v669_v0, %s640_s29 }
  0x42   :  { %418 = vperm.xlu0 %614, %v415_v6   ;;  %v598_v6 = vld [vmem:[%s848_s3 + $0x5] ss:$8 sm:$0xf] }
  0x43   :  { %v233_v8 = vrot.slane %v598_v6, %v725_v11  ;;  %v225_v14 = vrot.slane %v598_v6, %v723_v10 }
  0x74   :  { %v339_v15 = vpop.permute.xlu1 %338  ;;  %v335_v16 = vpop.permute.xlu0 %334 }
  0x78   :  { %v341_v21 = vpop.permute.xlu1 %340  ;;  %v337_v22 = vpop.permute.xlu0 %336 }
  0x79   :  { %v343_v23 = vsel %vm342_vm0, %v339_v15, %v341_v21  ;;  %v345_v24 = vsel %vm342_vm0, %v335_v16, %v337_v22  ;;  %v344_v25 = vsel %vm342_vm0, %v337_v22, %v339_v15  ;;  %v346_v26 = vsel %vm342_vm0, %v341_v21, %v335_v16 }
  0x7a   :  { %v371_v27 = vmul.f32 %v357_v17, %v344_v25  ;;  %v373_v28 = vmul.f32 %v365_v18, %v346_v26  ;;  %v370_v29 = vmul.f32 %v353_v19, %v345_v24  ;;  %v372_v30 = vmul.f32 %v361_v20, %v343_v23  ;;  %v597_v17 = vld [vmem:[%s848_s3 + $0x3] ss:$8 sm:$0xf] }
  0x7b   :  { %v229_v15 = vrot.slane %v598_v6, %v729_v13  ;;  %v221_v16 = vrot.slane %v598_v6, %v727_v12  ;;  %v173_v32 = vrot.slane %v597_v17, %v727_v12  ;;  %v36_v6 = vld [vmem:[%s848_s3] ss:$8 sm:$0xf] }
  0x7c   :  { %v293_v31 = vpop.permute.xlu1 %292  ;;  %439 = vmatprep.subr.mxu0 %v371_v27  ;;  %510 = vmatprep.subr.mxu1 %v373_v28  ;;  %v291_v33 = vpop.permute.xlu0 %290  ;;  %v177_v27 = vrot.slane %v597_v17, %v723_v10 }
  0x7d   :  { %440 = vmatpush1.msra.mxu0 %v370_v29  ;;  %511 = vmatpush1.msra.mxu1 %v372_v30  ;;  %v301_v38 = vsel %vm298_vm1, %v291_v33, %v293_v31 }
  0x7e   :  { %v326_v47 = vmul.f32 %v309_v37, %v301_v38 }
  0x80   :  { %v297_v39 = vpop.permute.xlu1 %296  ;;  %v295_v40 = vpop.permute.xlu0 %294 }
  0x81   :  { %v302_v41 = vsel %vm298_vm1, %v297_v39, %v291_v33  ;;  %v299_v42 = vsel %vm298_vm1, %v295_v40, %v297_v39  ;;  %v300_v43 = vsel %vm298_vm1, %v293_v31, %v295_v40 }
  0x82   :  { %v329_v44 = vmul.f32 %v321_v34, %v302_v41  ;;  %v327_v45 = vmul.f32 %v313_v35, %v300_v43  ;;  %v328_v46 = vmul.f32 %v317_v36, %v299_v42  ;;  %v181_v34 = vrot.slane %v597_v17, %v729_v13  ;;  %v596_v36 = vld [vmem:[%s848_s3 + $0x2] ss:$8 sm:$0xf] }
  0x83   :  { %v185_v35 = vrot.slane %v597_v17, %v725_v11  ;;  %v133_v41 = vrot.slane %v596_v36, %v723_v10 }
  0x84   :  { %v249_v48 = vpop.permute.xlu1 %248  ;;  %441 = vmatprep.subr.mxu0 %v327_v45  ;;  %512 = vmatprep.subr.mxu1 %v329_v44  ;;  %v247_v50 = vpop.permute.xlu0 %246 }
  0x85   :  { %442 = vmatpush1.msra.mxu0 %v326_v47  ;;  %513 = vmatpush1.msra.mxu1 %v328_v46  ;;  %v257_v55 = vsel %vm254_vm2, %v247_v50, %v249_v48  ;;  %v129_v46 = vrot.slane %v596_v36, %v727_v12  ;;  %v137_v47 = vrot.slane %v596_v36, %v729_v13 }
  0x86   :  { %v282_v4 = vmul.f32 %v265_v54, %v257_v55 }
  0x88   :  { %v253_v56 = vpop.permute.xlu1 %252  ;;  %v251_v57 = vpop.permute.xlu0 %250 }
  0x89   :  { %v258_v58 = vsel %vm254_vm2, %v253_v56, %v247_v50  ;;  %v255_v59 = vsel %vm254_vm2, %v251_v57, %v253_v56  ;;  %v256_v60 = vsel %vm254_vm2, %v249_v48, %v251_v57  ;;  %v141_v48 = vrot.slane %v596_v36, %v725_v11 }
  0x8a   :  { %v285_v61 = vmul.f32 %v277_v51, %v258_v58  ;;  %v283_v62 = vmul.f32 %v269_v52, %v256_v60  ;;  %v284_v63 = vmul.f32 %v273_v53, %v255_v59  ;;  %v89_v58 = vrot.slane %v595_v49, %v723_v10 }
  0x8c   :  { %v205_v5 = vpop.permute.xlu1 %204  ;;  %443 = vmatprep.subr.mxu0 %v283_v62  ;;  %514 = vmatprep.subr.mxu1 %v285_v61  ;;  %v203_v7 = vpop.permute.xlu0 %202 }
  0x8d   :  { %444 = vmatpush1.msra.mxu0 %v282_v4  ;;  %515 = vmatpush1.msra.mxu1 %v284_v63  ;;  %v213_v18 = vsel %vm210_vm3, %v203_v7, %v205_v5  ;;  %v85_v63 = vrot.slane %v595_v49, %v727_v12  ;;  %v93_v4 = vrot.slane %v595_v49, %v729_v13 }
  0x8e   :  { %v238_v28 = vmul.f32 %v221_v16, %v213_v18 }
  0x90   :  { %v209_v19 = vpop.permute.xlu1 %208  ;;  %v207_v20 = vpop.permute.xlu0 %206 }
  0x91   :  { %v214_v21 = vsel %vm210_vm3, %v209_v19, %v203_v7  ;;  %v211_v22 = vsel %vm210_vm3, %v207_v20, %v209_v19  ;;  %v212_v23 = vsel %vm210_vm3, %v205_v5, %v207_v20  ;;  %v97_v5 = vrot.slane %v595_v49, %v725_v11 }
  0x92   :  { %v241_v24 = vmul.f32 %v233_v8, %v214_v21  ;;  %v239_v25 = vmul.f32 %v225_v14, %v212_v23  ;;  %v240_v26 = vmul.f32 %v229_v15, %v211_v22  ;;  %v45_v20 = vrot.slane %v36_v6, %v723_v10 }
  0x94   :  { %v157_v29 = vpop.permute.xlu1 %156  ;;  %445 = vmatprep.subr.mxu0 %v239_v25  ;;  %516 = vmatprep.subr.mxu1 %v241_v24  ;;  %v155_v30 = vpop.permute.xlu0 %154  ;;  %v41_v25 = vrot.slane %v36_v6, %v727_v12  ;;  %v378_v12 = vld [vmem:[%s849_s1] sm:$0xff] }
  0x95   :  { %v165_v31 = vsel %vm162_vm4, %v155_v30, %v157_v29  ;;  %446 = vmatpush1.msra.mxu0 %v238_v28  ;;  %517 = vmatpush1.msra.mxu1 %v240_v26  ;;  %v49_v26 = vrot.slane %v36_v6, %v729_v13 }
  0x96   :  { %v191_v33 = vmul.f32 %v177_v27, %v165_v31  ;;  %447 = vmatprep.subr.mxu0 %v686_v3  ;;  %518 = vmatprep.subr.mxu1 %v681_v2  ;;  %v53_v27 = vrot.slane %v36_v6, %v725_v11 }
  0x97   :  { %448 = vmatpush1.msra.mxu0 %v674_v1  ;;  %519 = vmatpush1.msra.mxu1 %v669_v0 }
  0x98   :  { %v161_v37 = vpop.permute.xlu1 %160  ;;  %449 = vmatprep.subr.mxu0 %v191_v33  ;;  %v159_v38 = vpop.permute.xlu0 %158 }
  0x99   :  { %v166_v3 = vsel %vm162_vm4, %v161_v37, %v155_v30  ;;  %v163_v39 = vsel %vm162_vm4, %v159_v38, %v161_v37  ;;  %v164_v2 = vsel %vm162_vm4, %v157_v29, %v159_v38 }
  0x9a   :  { %v190_v1 = vmul.f32 %v173_v32, %v166_v3  ;;  %v192_v0 = vmul.f32 %v181_v34, %v164_v2  ;;  %v193_v40 = vmul.f32 %v185_v35, %v163_v39 }
  0x9c   :  { %v113_v42 = vpop.permute.xlu1 %112  ;;  %450 = vmatpush1.msra.mxu0 %v190_v1  ;;  %520 = vmatprep.subr.mxu1 %v193_v40  ;;  %v111_v43 = vpop.permute.xlu0 %110 }
  0x9d   :  { %v121_v44 = vsel %vm118_vm5, %v111_v43, %v113_v42  ;;  %521 = vmatpush1.msra.mxu1 %v192_v0 }
  0x9e   :  { %v147_v45 = vmul.f32 %v133_v41, %v121_v44 }
  0xa0   :  { %v117_v50 = vpop.permute.xlu1 %116  ;;  %451 = vmatprep.subr.mxu0 %v147_v45  ;;  %v115_v51 = vpop.permute.xlu0 %114 }
  0xa1   :  { %v122_v52 = vsel %vm118_vm5, %v117_v50, %v111_v43  ;;  %v119_v53 = vsel %vm118_vm5, %v115_v51, %v117_v50  ;;  %v120_v54 = vsel %vm118_vm5, %v113_v42, %v115_v51 }
  0xa2   :  { %v146_v55 = vmul.f32 %v129_v46, %v122_v52  ;;  %v148_v56 = vmul.f32 %v137_v47, %v120_v54  ;;  %v149_v57 = vmul.f32 %v141_v48, %v119_v53 }
  0xa4   :  { %v69_v59 = vpop.permute.xlu1 %68  ;;  %452 = vmatpush1.msra.mxu0 %v146_v55  ;;  %522 = vmatprep.subr.mxu1 %v149_v57  ;;  %v67_v60 = vpop.permute.xlu0 %66 }
  0xa5   :  { %v77_v61 = vsel %vm74_vm6, %v67_v60, %v69_v59  ;;  %523 = vmatpush1.msra.mxu1 %v148_v56 }
  0xa6   :  { %v103_v62 = vmul.f32 %v89_v58, %v77_v61 }
  0xa8   :  { %v73_v7 = vpop.permute.xlu1 %72  ;;  %453 = vmatprep.subr.mxu0 %v103_v62  ;;  %v71_v8 = vpop.permute.xlu0 %70 }
  0xa9   :  { %v78_v14 = vsel %vm74_vm6, %v73_v7, %v67_v60  ;;  %v75_v15 = vsel %vm74_vm6, %v71_v8, %v73_v7  ;;  %v76_v16 = vsel %vm74_vm6, %v69_v59, %v71_v8 }
  0xaa   :  { %v102_v17 = vmul.f32 %v85_v63, %v78_v14  ;;  %v104_v18 = vmul.f32 %v93_v4, %v76_v16  ;;  %v105_v19 = vmul.f32 %v97_v5, %v75_v15 }
  0xac   :  { %v24_v21 = vpop.permute.xlu1 %23  ;;  %454 = vmatpush1.msra.mxu0 %v102_v17  ;;  %524 = vmatprep.subr.mxu1 %v105_v19  ;;  %v22_v22 = vpop.permute.xlu0 %21 }
  0xad   :  { %v34_v23 = vsel %vm31_vm7, %v22_v22, %v24_v21  ;;  %525 = vmatpush1.msra.mxu1 %v104_v18 }
  0xae   :  { %v59_v24 = vmul.f32 %v45_v20, %v34_v23 }
  0xb0   :  { %v28_v28 = vpop.permute.xlu1 %27  ;;  %455 = vmatprep.subr.mxu0 %v59_v24  ;;  %v26_v29 = vpop.permute.xlu0 %25 }
  0xb1   :  { %v35_v10 = vsel %vm31_vm7, %v28_v28, %v22_v22  ;;  %v32_v30 = vsel %vm31_vm7, %v26_v29, %v28_v28  ;;  %v33_v31 = vsel %vm31_vm7, %v24_v21, %v26_v29 }
  0xb2   :  { %v58_v32 = vmul.f32 %v41_v25, %v35_v10  ;;  %v60_v33 = vmul.f32 %v49_v26, %v33_v31  ;;  %v61_v34 = vmul.f32 %v53_v27, %v32_v30 }
  0xb4   :  { %456 = vmatpush1.msra.mxu0 %v58_v32  ;;  %526 = vmatprep.subr.mxu1 %v61_v34 }
  0xb5   :  { %602 = vmatmul.mubr.msk.f32.vlgmr.msra.gmra.mxu0 %vm421_vm8, %v378_v12  ;;  %527 = vmatpush1.msra.mxu1 %v60_v33 }
  0xb6   :  { %603 = vmatmul.mubr.msk.f32.vlgmr.msra.gmra.mxu1 %vm421_vm8, %v378_v12 }
  0xbd   :  { %v419_v11 = vpop.permute.xlu0 %418 }
 0x175   :  { %v491_v13 = vpop.f32.mrf.mxu0 }
 0x176   :  { %v562_v35 = vpop.f32.mrf.mxu1  ;;  %v492_v36 = vadd.f32 %v491_v13, %v419_v11 }
 0x177   :  { %v563_v37 = vadd.f32 %v562_v35, %v419_v11  ;;  %v493_v9 = vpop.f32.mrf.mxu0 }
 0x178   :  { %v567_v38 = vsub.f32 0.0, %v492_v36  ;;  %v494_v3 = vadd.f32 %v493_v9, %v419_v11  ;;  %v564_v39 = vpop.f32.mrf.mxu1 }
 0x179   :  { %v569_v2 = vsub.f32 0.0, %v563_v37  ;;  %v565_v1 = vadd.f32 %v564_v39, %v419_v11 }
 0x17a   :  { %v571_v0 = vmul.f32 1.442695, %v567_v38  ;;  %v568_v40 = vsub.f32 0.0, %v494_v3 }
 0x17b   :  { %v575_v41 = vmul.f32 1.442695, %v569_v2  ;;  %v570_v42 = vsub.f32 0.0, %v565_v1 }
 0x17c   :  { %615 = vpow2.f32 %v571_v0  ;;  %v573_v43 = vmul.f32 1.442695, %v568_v40 }
 0x17d   :  { %617 = vpow2.f32 %v575_v41  ;;  %v577_v44 = vmul.f32 1.442695, %v570_v42 }
 0x17e   :  { %619 = vpow2.f32 %v573_v43 }
 0x17f   :  { %621 = vpow2.f32 %v577_v44 }
 0x189   :  { %v616_v45 = vpop.eup %615 }
 0x18a   :  { %v618_v46 = vpop.eup %617  ;;  %v579_v47 = vadd.f32 1.0, %v616_v45 }
 0x18b   :  { %v620_v48 = vpop.eup %619  ;;  %v581_v49 = vadd.f32 1.0, %v618_v46 }
 0x18c   :  { %v622_v50 = vpop.eup %621  ;;  %623 = vrcp.f32 %v579_v47  ;;  %v580_v51 = vadd.f32 1.0, %v620_v48 }
 0x18d   :  { %625 = vrcp.f32 %v581_v49  ;;  %v582_v52 = vadd.f32 1.0, %v622_v50 }
 0x18e   :  { %627 = vrcp.f32 %v580_v51 }
 0x18f   :  { %629 = vrcp.f32 %v582_v52 }
 0x199   :  { %v624_v53 = vpop.eup %623 }
 0x19a   :  { %v626_v54 = vpop.eup %625  ;;  %587 = vst [vmem:[%s850_s4] sm:$0xff] %v624_v53 }
 0x19b   :  { %v628_v55 = vpop.eup %627  ;;  %589 = vst [vmem:[%s850_s4 + $0x10] sm:$0xff] %v626_v54 }
 0x19c   :  { %v630_v56 = vpop.eup %629  ;;  %588 = vst [vmem:[%s850_s4 + $0x8] sm:$0xff] %v628_v55 }
 0x19d   :  { %590 = vst [vmem:[%s850_s4 + $0x18] sm:$0xff] %v630_v56 }

</bundles_post_ra>
